<compile_context>
chip_gen: v7x
topology: tpu7x:2x2x1
jax: 0.10.0
libtpu: 0.0.40
codegen_flags: <defaults>
</compile_context>

<pallas_src>
import functools

import jax
import jax.numpy as jnp
from jax.experimental import pallas as pl
from jax.experimental.pallas import tpu as pltpu


def _round_up(x, m):
    return ((x + m - 1) // m) * m


def _node_mlp_kernel(xT_ref, w1s_ref, shift_ref, w2_ref, o_ref, *, negative_slope):
    """One (E, TM) column tile of the transposed problem.

    xT_ref:    (E,  TM)  bf16  node features, feature-major (rows on lanes)
    w1s_ref:   (MID, E)  bf16  W1 with BN scale folded in (VMEM-resident)
    shift_ref: (MID, 1)  f32   BN shift = beta - mean * scale (resident)
    w2_ref:    (C,  MID) bf16  W2 (resident)
    o_ref:     (C,  TM)  f32   logits^T, lane-dense store
    """
    # Linear1 (+ folded BN scale): (MID, E) @ (E, TM) -> (MID, TM), f32 acc.
    h = jnp.dot(w1s_ref[...], xT_ref[...], preferred_element_type=jnp.float32)
    # BN shift + LeakyReLU in f32 on the VPU (broadcast along lanes).
    h = h + shift_ref[...]
    h = jnp.where(h >= 0, h, negative_slope * h)
    # Dropout: identity in eval mode.
    # Linear2: (C, MID) @ (MID, TM) -> (C, TM), f32 acc, unmasked lane store.
    o_ref[...] = jnp.dot(w2_ref[...], h.astype(w2_ref.dtype),
                         preferred_element_type=jnp.float32).astype(o_ref.dtype)


def prepare_node_mlp_params(w1, w2, bn_gamma, bn_beta, bn_mean, bn_var, eps=1e-5):
    """One-time weight prep (eval weights are static).

    Folds the BN scale into W1, keeps the BN shift separate, casts matmul
    operands to bf16.  Do this once, outside the per-call path.
    """
    scale = bn_gamma / jnp.sqrt(bn_var + eps)                    # (MID,)
    shift = bn_beta - bn_mean * scale                            # (MID,)
    return {
        "w1s": (w1 * scale[:, None]).astype(jnp.bfloat16),       # (MID, E)
        "shift": shift.reshape(-1, 1).astype(jnp.float32),       # (MID, 1)
        "w2": w2.astype(jnp.bfloat16),                           # (C, MID)
    }


def node_mlp_forward(node_feats, params, *, negative_slope=0.2, block_rows=1024):
    """node_feats: (B, N, E) float. Returns (B, N, nObjClasses) float32 logits."""
    B, N, E = node_feats.shape
    MID, E_w = params["w1s"].shape
    C = params["w2"].shape[0]
    assert E_w == E

    M = B * N
    # Row-tile size: multiple of 128 so the flattened row axis is lane-dense.
    tm = min(_round_up(block_rows, 128), _round_up(M, 128))
    m_pad = _round_up(M, tm)                  # pad, never drop trailing rows

    # Feature-major slab (E, M_pad), bf16: rows ride the 128-lane axis.
    xT = jnp.transpose(node_feats.reshape(M, E)).astype(jnp.bfloat16)
    if m_pad != M:
        xT = jnp.pad(xT, ((0, 0), (0, m_pad - M)))

    kernel = functools.partial(_node_mlp_kernel, negative_slope=negative_slope)

    outT = pl.pallas_call(
        kernel,
        out_shape=jax.ShapeDtypeStruct((C, m_pad), jnp.float32),
        grid_spec=pltpu.PrefetchScalarGridSpec(
            num_scalar_prefetch=0,
            grid=(pl.cdiv(m_pad, tm),),
            in_specs=[
                pl.BlockSpec((E, tm), lambda i: (0, i)),        # x^T column tile
                pl.BlockSpec((MID, E), lambda i: (0, 0)),       # W1*scale (resident)
                pl.BlockSpec((MID, 1), lambda i: (0, 0)),       # BN shift (resident)
                pl.BlockSpec((C, MID), lambda i: (0, 0)),       # W2 (resident)
            ],
            out_specs=pl.BlockSpec((C, tm), lambda i: (0, i)),  # logits^T tile
        ),
        # Row tiles are independent -> megacore shards them on v7x.
        # (If DMA is still exposed on v5e, pipeline_mode=pl.Buffered(3) on the
        #  x^T spec is the next knob; not needed at these sizes.)
        compiler_params=pltpu.CompilerParams(
            dimension_semantics=("parallel",)),
    )(xT, params["w1s"], params["shift"], params["w2"])

    # Tiny (M x C) transpose back to the PyTorch layout.
    return jnp.transpose(outT[:, :M]).reshape(B, N, C)


def _reference_f32(node_feats, w1, w2, g, b, m, v, negative_slope=0.2, eps=1e-5):
    x = jnp.einsum("bne,me->bnm", node_feats, w1,
                   precision=jax.lax.Precision.HIGHEST)
    scale = g / jnp.sqrt(v + eps)
    shift = b - m * scale
    x = x * scale + shift
    x = jnp.where(x >= 0, x, negative_slope * x)
    return jnp.einsum("bnm,cm->bnc", x, w2,
                      precision=jax.lax.Precision.HIGHEST)


def _reference_bf16(node_feats, w1, w2, g, b, m, v, negative_slope=0.2, eps=1e-5):
    # Same bf16 operand quantization as the kernel, f32 accumulation.
    scale = g / jnp.sqrt(v + eps)
    shift = b - m * scale
    w1s = (w1 * scale[:, None]).astype(jnp.bfloat16).astype(jnp.float32)
    xq = node_feats.astype(jnp.bfloat16).astype(jnp.float32)
    h = jnp.einsum("bne,me->bnm", xq, w1s,
                   precision=jax.lax.Precision.HIGHEST) + shift
    h = jnp.where(h >= 0, h, negative_slope * h)
    hq = h.astype(jnp.bfloat16).astype(jnp.float32)
    w2q = w2.astype(jnp.bfloat16).astype(jnp.float32)
    return jnp.einsum("bnm,cm->bnc", hq, w2q,
                      precision=jax.lax.Precision.HIGHEST)


if __name__ == "__main__":
    # Small shapes consistent with the module:
    #   embeddings E = 32, mid = 16, nObjClasses = 10, batch B = 2, nodes N = 8
    B, N, E, C = 2, 8, 32, 10
    MID = E // 2

    key = jax.random.PRNGKey(0)
    k_x, k_w1, k_w2, k_g, k_b, k_m, k_v = jax.random.split(key, 7)

    node_feats = jax.random.normal(k_x, (B, N, E), dtype=jnp.float32)
    w1 = jax.random.normal(k_w1, (MID, E), dtype=jnp.float32) * 0.1
    w2 = jax.random.normal(k_w2, (C, MID), dtype=jnp.float32) * 0.1
    bn_gamma = 1.0 + 0.05 * jax.random.normal(k_g, (MID,), dtype=jnp.float32)
    bn_beta = 0.05 * jax.random.normal(k_b, (MID,), dtype=jnp.float32)
    bn_mean = 0.1 * jax.random.normal(k_m, (MID,), dtype=jnp.float32)
    bn_var = jnp.abs(1.0 + 0.1 * jax.random.normal(k_v, (MID,), dtype=jnp.float32))

    # One-time parameter prep (BN fold + bf16 cast) hoisted out of the call path.
    params = prepare_node_mlp_params(w1, w2, bn_gamma, bn_beta, bn_mean, bn_var)

    fwd = jax.jit(functools.partial(node_mlp_forward,
                                    negative_slope=0.2, block_rows=1024))
    out = jax.block_until_ready(fwd(node_feats, params))
    assert out.shape == (B, N, C)

    # Tight check vs a reference using the same bf16 operand quantization.
    ref_bf16 = _reference_bf16(node_feats, w1, w2,
                               bn_gamma, bn_beta, bn_mean, bn_var)
    assert jnp.allclose(out, ref_bf16, atol=5e-3, rtol=5e-3)

    # Loose check vs the pure-f32 PyTorch-equivalent reference (bf16 operands
    # in the kernel cost a few mantissa bits; accumulation stays f32).
    ref_f32 = _reference_f32(node_feats, w1, w2,
                             bn_gamma, bn_beta, bn_mean, bn_var)
    assert jnp.allclose(out, ref_f32, atol=5e-2, rtol=5e-2)

    print("KERNEL_OK")
</pallas_src>

<mosaic_0001>
module attributes {stable_mosaic.version = 11 : i64} {
  func.func @_node_mlp_kernel(%arg0: i32, %arg1: memref<32x128xbf16, #tpu.memory_space<vmem>>, %arg2: memref<16x32xbf16, #tpu.memory_space<vmem>>, %arg3: memref<16x1xf32, #tpu.memory_space<vmem>>, %arg4: memref<10x16xbf16, #tpu.memory_space<vmem>>, %arg5: memref<10x128xf32, #tpu.memory_space<vmem>>) attributes {dimension_semantics = [#tpu.dimension_semantics<parallel>], iteration_bounds = array<i64: 1>, scalar_prefetch = 0 : i64, scratch_operands = 0 : i64, tpu.core_type = #tpu.core_type<tc>, window_params = [{transform_indices = @transform_0, window_bounds = array<i64: 32, 128>}, {pipeline_mode = #tpu.pipeline_mode<synchronous>, transform_indices = @transform_1, window_bounds = array<i64: 16, 32>}, {pipeline_mode = #tpu.pipeline_mode<synchronous>, transform_indices = @transform_2, window_bounds = array<i64: 16, 1>}, {pipeline_mode = #tpu.pipeline_mode<synchronous>, transform_indices = @transform_3, window_bounds = array<i64: 10, 16>}, {transform_indices = @transform_4, window_bounds = array<i64: 10, 128>}]} {
    %c0 = arith.constant 0 : index
    %c0_0 = arith.constant 0 : index
    %0 = vector.load %arg2[%c0, %c0_0] : memref<16x32xbf16, #tpu.memory_space<vmem>>, vector<16x32xbf16>
    %c0_1 = arith.constant 0 : index
    %c0_2 = arith.constant 0 : index
    %1 = vector.load %arg1[%c0_1, %c0_2] : memref<32x128xbf16, #tpu.memory_space<vmem>>, vector<32x128xbf16>
    %cst = arith.constant dense<0.000000e+00> : vector<16x128xf32>
    %2 = tpu.matmul %0, %1, %cst {dimension_numbers = #tpu.dot_dimension_numbers<[1], [0], [0], [1], [0, 0, 1, 1], [], []>} : vector<16x32xbf16>, vector<32x128xbf16>, vector<16x128xf32> -> vector<16x128xf32>
    %c0_3 = arith.constant 0 : index
    %c0_4 = arith.constant 0 : index
    %3 = vector.load %arg3[%c0_3, %c0_4] : memref<16x1xf32, #tpu.memory_space<vmem>>, vector<16x1xf32>
    %4 = vector.broadcast %3 : vector<16x1xf32> to vector<16x128xf32>
    %5 = arith.addf %2, %4 : vector<16x128xf32>
    %cst_5 = arith.constant 0.000000e+00 : f32
    %6 = vector.broadcast %cst_5 : f32 to vector<16x128xf32>
    %7 = arith.cmpf oge, %5, %6 : vector<16x128xf32>
    %cst_6 = arith.constant 2.000000e-01 : f32
    %8 = vector.broadcast %cst_6 : f32 to vector<16x128xf32>
    %9 = arith.mulf %8, %5 : vector<16x128xf32>
    %10 = arith.select %7, %5, %9 : vector<16x128xi1>, vector<16x128xf32>
    %c0_7 = arith.constant 0 : index
    %c0_8 = arith.constant 0 : index
    %11 = vector.load %arg4[%c0_7, %c0_8] : memref<10x16xbf16, #tpu.memory_space<vmem>>, vector<10x16xbf16>
    %12 = arith.truncf %10 : vector<16x128xf32> to vector<16x128xbf16>
    %cst_9 = arith.constant dense<0.000000e+00> : vector<10x128xf32>
    %13 = tpu.matmul %11, %12, %cst_9 {dimension_numbers = #tpu.dot_dimension_numbers<[1], [0], [0], [1], [0, 0, 1, 1], [], []>} : vector<10x16xbf16>, vector<16x128xbf16>, vector<10x128xf32> -> vector<10x128xf32>
    %c0_10 = arith.constant 0 : index
    %c0_11 = arith.constant 0 : index
    %14 = vector.load %arg5[%c0_10, %c0_11] : memref<10x128xf32, #tpu.memory_space<vmem>>, vector<10x128xf32>
    tpu.vector_store %arg5[%c0_10, %c0_11], %13 {strides = array<i32>} : memref<10x128xf32, #tpu.memory_space<vmem>>, vector<10x128xf32>,
    return
  }
  func.func @transform_0(%arg0: i32) -> (i32, i32) {
    %c0_i32 = arith.constant 0 : i32
    %c0_i32_0 = arith.constant 0 : i32
    return %c0_i32, %arg0 : i32, i32
  }
  func.func @transform_1(%arg0: i32) -> (i32, i32) {
    %c0_i32 = arith.constant 0 : i32
    %c0_i32_0 = arith.constant 0 : i32
    %c0_i32_1 = arith.constant 0 : i32
    return %c0_i32, %c0_i32_0 : i32, i32
  }
  func.func @transform_2(%arg0: i32) -> (i32, i32) {
    %c0_i32 = arith.constant 0 : i32
    %c0_i32_0 = arith.constant 0 : i32
    %c0_i32_1 = arith.constant 0 : i32
    return %c0_i32, %c0_i32_0 : i32, i32
  }
  func.func @transform_3(%arg0: i32) -> (i32, i32) {
    %c0_i32 = arith.constant 0 : i32
    %c0_i32_0 = arith.constant 0 : i32
    %c0_i32_1 = arith.constant 0 : i32
    return %c0_i32, %c0_i32_0 : i32, i32
  }
  func.func @transform_4(%arg0: i32) -> (i32, i32) {
    %c0_i32 = arith.constant 0 : i32
    %c0_i32_0 = arith.constant 0 : i32
    return %c0_i32, %arg0 : i32, i32
  }
}

</mosaic_0001>

<bundles_post_ra>
// kernel: node_mlp_forward.1
= control target key start
LH: loop header
LB: loop body
LE: loop exit
PB: predicated region body
PF: predicated region fallthrough
CT: control target
= control target key end

     0   :  { %v196_v0 = vmov 0.0   ;;  %vm197_vm0 = vmmov 0   ;;  %v198_v2 = vmov 0   ;;  %vm53_vm1 = vcmask 261120   ;;  %s248_s0 = inlined_call_operand.vmem [shape: bf16[32,128], index: 0, kind: input, shape index: {}]   ;;  %s249_s2 = inlined_call_operand.vmem [shape: f32[16,1], index: 2, kind: input, shape index: {}]   ;;  %s250_s1 = inlined_call_operand.vmem [shape: bf16[16,32], index: 1, kind: input, shape index: {}]   ;;  %s251_s3 = inlined_call_operand.vmem [shape: bf16[10,16], index: 3, kind: input, shape index: {}]   ;;  %s252_s4 = inlined_call_operand.vmem [shape: f32[10,128], index: 4, kind: output, shape index: {}]  }
   0x1   :  { %174 = vmatprep.subr.bf16.mxu0 %v196_v0  ;;  %v192_v1 = vld [vmem:[%s248_s0] sm:$0xff]   ;;  %178 = vmatprep.mubr.msk.bf16.mxu0 %vm197_vm0, %v196_v0  ;;  %v193_v3 = vld [vmem:[%s248_s0 + $0x8] sm:$0xff]   ;;  %vm112_vm4 = vcmask 130048  }
   0x2   :  { %191 = vset.pattern.permute.xlu0 %v198_v2  ;;  %182 = vmatprep.subr.bf16.mxu1 %v196_v0  ;;  %v24_v4 = vld [vmem:[%s249_s2] sm:$0xff]  ;;  %v25_v6 = vld [vmem:[%s249_s2 + $0x8] sm:$0xff] }
   0x3   :  { %175 = vmatpush3.bf16.msra.mxu0 %v192_v1  ;;  %184 = vmatprep.mubr.msk.bf16.mxu1 %vm197_vm0, %v196_v0  ;;  %v194_v5 = vld [vmem:[%s250_s1] sm:$0xff]  }
   0x4   :  { %176 = vmatprep.subr.bf16.mxu0 %v196_v0  ;;  %28 = vperm.xlu0 %191, %v24_v4   ;;  %v195_v20 = vld [vmem:[%s251_s3] sm:$0x1f]  }
   0x7   :  { %177 = vmatpush3.bf16.msra.mxu0 %v193_v3 }
   0x8   :  { %33 = vperm.xlu0 %191, %v25_v6  }
   0xa   :  { %179 = vmatmul.mubr.msk.bf16.vlgmr.msra.gmra.mrb[0].mxu0 %vm53_vm1, %v194_v5 }
  0x83   :  { %v29_v7 = vpop.permute.xlu0 %28 }
  0x87   :  { %v34_v11 = vpop.permute.xlu0 %33 }
  0xdd   :  { %v91_v8 = vpop.f32.mrb[0].mxu0 }
  0xde   :  { %v92_v9 = vadd.f32 %v91_v8, %v29_v7  ;;  %v180_v10 = vpop.f32.mrb[1].mxu0 }
  0xdf   :  { %v94_v12 = vpop.f32.mrb[2].mxu0 }
  0xe0   :  { %v100_v13 = vmul.f32 0.2, %v92_v9  ;;  %v95_v14 = vadd.f32 %v94_v12, %v34_v11  ;;  %v181_v15 = vpop.f32.mrb[3].mxu0  ;;  %vm98_vm2 = vcmp.ge.f32.partialorder %v92_v9, 0.0 }
  0xe2   :  { %v101_v16 = vmul.f32 0.2, %v95_v14  ;;  %vm99_vm3 = vcmp.ge.f32.partialorder %v95_v14, 0.0  ;;  %v102_v17 = vsel %vm98_vm2, %v92_v9, %v100_v13 }
  0xe4   :  { %v103_v18 = vsel %vm99_vm3, %v95_v14, %v101_v16 }
  0xe5   :  { %v106_v19 = vpack.c.bf16 %v103_v18, %v102_v17 }
  0xe7   :  { %183 = vmatpush3.bf16.msra.mxu1 %v106_v19 }
  0xea   :  { %185 = vmatmul.mubr.msk.bf16.vlgmr.msra.gmra.mrb[0].mxu1 %vm112_vm4, %v195_v20 }
 0x1bd   :  { %v150_v21 = vpop.f32.mrb[0].mxu1 }
 0x1be   :  { %157 = vst [vmem:[%s252_s4] sm:$0xff] %v150_v21  ;;  %v186_v22 = vpop.f32.mrb[1].mxu1 }
 0x1bf   :  { %v153_v23 = vpop.f32.mrb[2].mxu1 }
 0x1c0   :  { %158 = vst [vmem:[%s252_s4 + $0x8] sm:$0x3] %v153_v23  ;;  %v187_v24 = vpop.f32.mrb[3].mxu1 }

</bundles_post_ra>
